<compile_context>
chip_gen: v6e
topology: v6e:2x2x1
jax: 0.10.0
libtpu: 0.0.40
codegen_flags: <defaults>
</compile_context>

<pallas_src>
import jax
import jax.numpy as jnp
from jax import lax
from jax.experimental import pallas as pl
from jax.experimental.pallas import tpu as pltpu

# FocalLoss defaults
GAMMA = 2.0
FOCAL_ALPHA = 0.8
# FocalSurfaceLoss defaults (strategy='constant', alpha=1)
SURFACE_ALPHA = 1.0

LANE = 128
MAX_TILE_ROWS = 1024                     # up to 1024x128 f32 rows per input block
VMEM_BLOCK_BUDGET = 10 * 1024 * 1024     # double-buffered input blocks budget


# ----------------------------- Pallas kernel -------------------------------
def _make_loss_kernel(rows, tile_rows, acc_rows, soft_targets):
    """rows: true number of (128-lane) spatial rows per image.
    tile_rows: rows per spatial block.  acc_rows: 8 (vreg-add reduce) or 1."""
    ragged = (rows % tile_rows) != 0

    def kernel(p_ref, y_ref, d_ref, bce_ref, pd_ref):
        s = pl.program_id(1)                       # sequential spatial axis

        # Init the per-image partial-sum blocks at the start of each image's
        # spatial sweep.  Guarded on the *arbitrary* axis only, so the leading
        # batch axis can be 'parallel' (v7x 2-TC split) without races.
        @pl.when(s == 0)
        def _():
            bce_ref[...] = jnp.zeros_like(bce_ref)
            pd_ref[...] = jnp.zeros_like(pd_ref)

        p = p_ref[...]                             # (K, tile_rows, 128) f32
        y = y_ref[...]                             # (K, tile_rows, 128) f32
        d = d_ref[...]                             # (tile_rows, 128)    f32

        if soft_targets:
            # General two-log form (PyTorch F.binary_cross_entropy with the
            # log clamp at -100), supports soft targets.
            log_p = jnp.maximum(jnp.log(p), -100.0)
            log_1mp = jnp.maximum(jnp.log(1.0 - p), -100.0)
            bce = -(y * log_p + (1.0 - y) * log_1mp)
        else:
            # Hard {0,1} labels: identical result with a single log (EUP) and
            # one select instead of two logs + three muls.
            p_t = jnp.where(y != 0.0, p, 1.0 - p)
            bce = -jnp.maximum(jnp.log(p_t), -100.0)

        # Surface term: dist map is shared across channels, so reduce K first
        # (pure vreg adds) and multiply by the single dist tile.
        pd = jnp.sum(p, axis=0) * d                # (tile_rows, 128)

        if ragged:
            # Mask the rows past the true spatial extent in the last block
            # (Pallas edge blocks carry unspecified values there).
            row = s * tile_rows + lax.broadcasted_iota(
                jnp.int32, (tile_rows, LANE), 0)
            valid = row < rows
            bce = jnp.where(valid[None, :, :], bce, 0.0)
            pd = jnp.where(valid, pd, 0.0)

        if acc_rows == 8:
            # Reduce the tile to one (8,128) vreg with pure VALU vreg adds
            # (layout-preserving reshape; no XLU), then accumulate: the
            # per-step accumulator read-modify-write is ~2 vregs total.
            bce_ref[...] += bce.reshape(-1, 8, LANE).sum(axis=0)
            pd_ref[...] += pd.reshape(-1, 8, LANE).sum(axis=0)
        else:
            # Single small spatial block per image: one cross-sublane reduce.
            bce_ref[...] += jnp.sum(jnp.sum(bce, axis=0), axis=0, keepdims=True)
            pd_ref[...] += jnp.sum(pd, axis=0, keepdims=True)

    return kernel


def _choose_tile_rows(rows, K, max_tile_rows):
    """Pick tile_rows (multiple of 8 unless it covers the whole image) and the
    number of spatial tiles, balanced so the masked overrun stays small."""
    per_row_bytes = (2 * K + 1) * LANE * 4          # prob + label + dist, f32
    cap = VMEM_BLOCK_BUDGET // (2 * per_row_bytes)  # 2x: double-buffering
    cap = max(8, min(max_tile_rows, (cap // 8) * 8))
    if rows <= cap:
        return rows, 1                              # one block covers the image
    n_s = -(-rows // cap)
    tr = ((-(-rows // n_s) + 7) // 8) * 8           # balance, round up to 8
    return tr, -(-rows // tr)


def focal_surface_loss(prob, label, dist_bhw, *, soft_targets=False,
                       max_tile_rows=MAX_TILE_ROWS):
    """prob/label: (B, K, H, W); dist_bhw: (B, H, W) distance map (shared over K).

    Returns the scalar FocalSurfaceLoss (strategy='constant', alpha=1).
    Labels are assumed hard {0,1} unless soft_targets=True.
    """
    B, K, H, W = prob.shape
    S = H * W
    n_true = B * K * S

    # astype(f32) is a no-op for f32 callers (no extra HBM pass).
    p3 = prob.reshape(B, K, S).astype(jnp.float32)
    y3 = label.reshape(B, K, S).astype(jnp.float32)
    d2 = dist_bhw.reshape(B, S).astype(jnp.float32)

    # Lane alignment.  Only taken if H*W is not a multiple of 128.
    # TODO(synk): lane-unaligned spatial sizes still cost one pad copy here.
    pad = (-S) % LANE
    if pad:
        p3 = jnp.pad(p3, ((0, 0), (0, 0), (0, pad)), constant_values=1.0)
        y3 = jnp.pad(y3, ((0, 0), (0, 0), (0, pad)), constant_values=1.0)
        d2 = jnp.pad(d2, ((0, 0), (0, pad)), constant_values=0.0)
    S_lane = S + pad
    rows = S_lane // LANE

    # Free (metadata-only) reshapes to a lane-dense (rows, 128) spatial layout.
    p4 = p3.reshape(B, K, rows, LANE)
    y4 = y3.reshape(B, K, rows, LANE)
    d3 = d2.reshape(B, rows, LANE)

    tile_rows, n_s = _choose_tile_rows(rows, K, max_tile_rows)
    acc_rows = 8 if tile_rows % 8 == 0 else 1

    cost = pl.CostEstimate(
        flops=7 * n_true,
        transcendentals=(2 if soft_targets else 1) * n_true,
        bytes_accessed=8 * B * K * S_lane + 4 * B * S_lane
                       + 2 * 4 * B * acc_rows * LANE,
    )

    bce_part, pd_part = pl.pallas_call(
        _make_loss_kernel(rows, tile_rows, acc_rows, soft_targets),
        out_shape=(
            jax.ShapeDtypeStruct((B, acc_rows, LANE), jnp.float32),
            jax.ShapeDtypeStruct((B, acc_rows, LANE), jnp.float32),
        ),
        grid_spec=pltpu.PrefetchScalarGridSpec(
            num_scalar_prefetch=0,
            grid=(B, n_s),
            in_specs=[
                # Whole channel axis per step (channel chunking): large
                # effective tiles even for small H*W.
                pl.BlockSpec((None, K, tile_rows, LANE),
                             lambda b, s: (b, 0, s, 0)),
                pl.BlockSpec((None, K, tile_rows, LANE),
                             lambda b, s: (b, 0, s, 0)),
                # dist has no channel axis: DMA'd once per (b, s) block and
                # broadcast over K inside the kernel.
                pl.BlockSpec((None, tile_rows, LANE),
                             lambda b, s: (b, s, 0)),
            ],
            out_specs=[
                pl.BlockSpec((None, acc_rows, LANE), lambda b, s: (b, 0, 0)),
                pl.BlockSpec((None, acc_rows, LANE), lambda b, s: (b, 0, 0)),
            ],
        ),
        compiler_params=pltpu.CompilerParams(
            dimension_semantics=("parallel", "arbitrary"),
            vmem_limit_bytes=32 * 1024 * 1024,
        ),
        cost_estimate=cost,
    )(p4, y4, d3)

    # Epilogue in the wrapper (tiny): combine per-image partial sums, apply the
    # focal nonlinearity once.  Keeping it here is what makes the 'parallel'
    # batch axis (v7x 2-TC split) correct.
    inv_n = 1.0 / float(n_true)
    bce_mean = jnp.sum(bce_part) * inv_n
    focal = FOCAL_ALPHA * (1.0 - jnp.exp(-bce_mean)) ** GAMMA * bce_mean
    surface = jnp.sum(pd_part) * inv_n
    return focal + SURFACE_ALPHA * surface


# ------------------- SurfaceLoss distance-map preprocessing -----------------
# In PyTorch this is scipy's euclidean distance transform run on CPU (pure
# label preprocessing, not the hot path).  Here it is a brute-force pairwise
# Euclidean distance computed in plain JAX glue (resolution = [1, 1]).
def _dist_map_2d(posmask):
    H, W = posmask.shape
    yy, xx = jnp.meshgrid(
        jnp.arange(H, dtype=jnp.float32),
        jnp.arange(W, dtype=jnp.float32),
        indexing="ij",
    )
    coords = jnp.stack([yy.ravel(), xx.ravel()], axis=-1)            # (N, 2)
    diff = coords[:, None, :] - coords[None, :, :]
    dist = jnp.sqrt(jnp.sum(diff * diff, axis=-1))                   # (N, N)
    m = posmask.ravel()
    BIG = 1e9
    d_to_pos = jnp.min(jnp.where(m[None, :], dist, BIG), axis=1)
    d_to_neg = jnp.min(jnp.where(~m[None, :], dist, BIG), axis=1)
    # one_hot2dist: negmask*edt(negmask) - posmask*(edt(posmask) - 1)
    res = jnp.where(m, -(d_to_neg - 1.0), d_to_pos)
    # if no positive pixels the map is all zeros (posmask.any() check)
    res = jnp.where(jnp.any(m), res, 0.0)
    # TODO(synk): scipy's all-foreground (no background) edge case and the
    # O((H*W)^2) memory of this brute-force transform are not production-grade.
    return res.reshape(H, W).astype(jnp.float32)


def _label_to_dist_map(label):
    # Mirrors SurfaceLoss.one_hot2dist: per-batch map computed from channel 0
    # (posmask = seg[k][0, :, :]), shared across the K channel axis.
    pos = label[:, 0].astype(bool)
    return jax.vmap(_dist_map_2d)(pos)                                # (B, H, W)


# ------------------------------- reference ----------------------------------
def _reference_loss(prob, label, dist_bhw):
    p = prob.reshape(-1).astype(jnp.float32)
    y = label.reshape(-1).astype(jnp.float32)
    log_p = jnp.maximum(jnp.log(p), -100.0)
    log_1mp = jnp.maximum(jnp.log(1.0 - p), -100.0)
    bce = jnp.mean(-(y * log_p + (1.0 - y) * log_1mp))
    focal = FOCAL_ALPHA * (1.0 - jnp.exp(-bce)) ** GAMMA * bce
    d = jnp.broadcast_to(dist_bhw[:, None, :, :], prob.shape).astype(jnp.float32)
    surface = jnp.mean(prob.astype(jnp.float32) * d)
    return focal + SURFACE_ALPHA * surface


if __name__ == "__main__":
    key = jax.random.PRNGKey(0)
    kp, kl = jax.random.split(key)

    # Small config: single spatial block per image (case A).
    B, K, H, W = 2, 4, 16, 16
    prob = jax.random.uniform(kp, (B, K, H, W), jnp.float32, 0.01, 0.99)
    label = jax.random.bernoulli(kl, 0.5, (B, K, H, W)).astype(jnp.float32)
    dist = _label_to_dist_map(label)                # SurfaceLoss label transform

    loss = jax.block_until_ready(focal_surface_loss(prob, label, dist))
    ref = _reference_loss(prob, label, dist)
    assert jnp.allclose(loss, ref, rtol=1e-4, atol=1e-5), (float(loss), float(ref))

    # Larger config forcing the multi-tile path with a ragged, in-kernel-masked
    # spatial tail (rows=18, tile_rows=8, 3 spatial tiles).
    kp2, kl2 = jax.random.split(jax.random.PRNGKey(1))
    B2, K2, H2, W2 = 2, 4, 48, 48
    prob2 = jax.random.uniform(kp2, (B2, K2, H2, W2), jnp.float32, 0.01, 0.99)
    label2 = jax.random.bernoulli(kl2, 0.5, (B2, K2, H2, W2)).astype(jnp.float32)
    dist2 = _label_to_dist_map(label2)
    loss2 = jax.block_until_ready(
        focal_surface_loss(prob2, label2, dist2, max_tile_rows=8))
    ref2 = _reference_loss(prob2, label2, dist2)
    assert jnp.allclose(loss2, ref2, rtol=2e-4, atol=1e-5), (float(loss2), float(ref2))

    print("KERNEL_OK")
</pallas_src>

<mosaic_0001>
module attributes {stable_mosaic.version = 11 : i64} {
  func.func @kernel(%arg0: i32, %arg1: i32, %arg2: memref<1x4x2x128xf32, #tpu.memory_space<vmem>>, %arg3: memref<1x4x2x128xf32, #tpu.memory_space<vmem>>, %arg4: memref<1x2x128xf32, #tpu.memory_space<vmem>>, %arg5: memref<1x1x128xf32, #tpu.memory_space<vmem>>, %arg6: memref<1x1x128xf32, #tpu.memory_space<vmem>>) attributes {dimension_semantics = [#tpu.dimension_semantics<parallel>, #tpu.dimension_semantics<arbitrary>], iteration_bounds = array<i64: 2, 1>, scalar_prefetch = 0 : i64, scratch_operands = 0 : i64, tpu.core_type = #tpu.core_type<tc>, window_params = [{transform_indices = @transform_0, window_bounds = array<i64: 1, 4, 2, 128>}, {transform_indices = @transform_1, window_bounds = array<i64: 1, 4, 2, 128>}, {transform_indices = @transform_2, window_bounds = array<i64: 1, 2, 128>}, {transform_indices = @transform_3, window_bounds = array<i64: 1, 1, 128>}, {transform_indices = @transform_4, window_bounds = array<i64: 1, 1, 128>}]} {
    %c0_i32 = arith.constant 0 : i32
    %0 = arith.cmpi eq, %arg1, %c0_i32 : i32
    %1 = arith.extui %0 : i1 to i32
    %c0_i32_0 = arith.constant 0 : i32
    %2 = arith.cmpi ne, %1, %c0_i32_0 : i32
    scf.if %2 {
      %cst_30 = arith.constant 0.000000e+00 : f32
      %38 = vector.broadcast %cst_30 : f32 to vector<1x128xf32>
      %c0_31 = arith.constant 0 : index
      %c0_32 = arith.constant 0 : index
      %c0_33 = arith.constant 0 : index
      %39 = vector.load %arg5[%c0_31, %c0_32, %c0_33] : memref<1x1x128xf32, #tpu.memory_space<vmem>>, vector<1x1x128xf32>
      %40 = vector.shape_cast %39 : vector<1x1x128xf32> to vector<1x128xf32>
      %41 = vector.shape_cast %38 : vector<1x128xf32> to vector<1x1x128xf32>
      tpu.vector_store %arg5[%c0_31, %c0_32, %c0_33], %41 {strides = array<i32>} : memref<1x1x128xf32, #tpu.memory_space<vmem>>, vector<1x1x128xf32>,
      %cst_34 = arith.constant 0.000000e+00 : f32
      %42 = vector.broadcast %cst_34 : f32 to vector<1x128xf32>
      %c0_35 = arith.constant 0 : index
      %c0_36 = arith.constant 0 : index
      %c0_37 = arith.constant 0 : index
      %43 = vector.load %arg6[%c0_35, %c0_36, %c0_37] : memref<1x1x128xf32, #tpu.memory_space<vmem>>, vector<1x1x128xf32>
      %44 = vector.shape_cast %43 : vector<1x1x128xf32> to vector<1x128xf32>
      %45 = vector.shape_cast %42 : vector<1x128xf32> to vector<1x1x128xf32>
      tpu.vector_store %arg6[%c0_35, %c0_36, %c0_37], %45 {strides = array<i32>} : memref<1x1x128xf32, #tpu.memory_space<vmem>>, vector<1x1x128xf32>,
    } else {
    }
    %c0 = arith.constant 0 : index
    %c0_1 = arith.constant 0 : index
    %c0_2 = arith.constant 0 : index
    %c0_3 = arith.constant 0 : index
    %3 = vector.load %arg2[%c0, %c0_1, %c0_2, %c0_3] : memref<1x4x2x128xf32, #tpu.memory_space<vmem>>, vector<1x4x2x128xf32>
    %4 = vector.shape_cast %3 : vector<1x4x2x128xf32> to vector<4x2x128xf32>
    %c0_4 = arith.constant 0 : index
    %c0_5 = arith.constant 0 : index
    %c0_6 = arith.constant 0 : index
    %c0_7 = arith.constant 0 : index
    %5 = vector.load %arg3[%c0_4, %c0_5, %c0_6, %c0_7] : memref<1x4x2x128xf32, #tpu.memory_space<vmem>>, vector<1x4x2x128xf32>
    %6 = vector.shape_cast %5 : vector<1x4x2x128xf32> to vector<4x2x128xf32>
    %c0_8 = arith.constant 0 : index
    %c0_9 = arith.constant 0 : index
    %c0_10 = arith.constant 0 : index
    %7 = vector.load %arg4[%c0_8, %c0_9, %c0_10] : memref<1x2x128xf32, #tpu.memory_space<vmem>>, vector<1x2x128xf32>
    %8 = vector.shape_cast %7 : vector<1x2x128xf32> to vector<2x128xf32>
    %cst = arith.constant 0.000000e+00 : f32
    %9 = vector.broadcast %cst : f32 to vector<4x2x128xf32>
    %10 = arith.cmpf one, %6, %9 : vector<4x2x128xf32>
    %cst_11 = arith.constant 1.000000e+00 : f32
    %11 = vector.broadcast %cst_11 : f32 to vector<4x2x128xf32>
    %12 = arith.subf %11, %4 : vector<4x2x128xf32>
    %13 = arith.select %10, %4, %12 : vector<4x2x128xi1>, vector<4x2x128xf32>
    %14 = math.log %13 : vector<4x2x128xf32>
    %cst_12 = arith.constant -1.000000e+02 : f32
    %15 = vector.broadcast %cst_12 : f32 to vector<4x2x128xf32>
    %16 = arith.maximumf %14, %15 : vector<4x2x128xf32>
    %cst_13 = arith.constant 0.000000e+00 : f32
    %17 = vector.broadcast %cst_13 : f32 to vector<4x2x128xf32>
    %18 = arith.subf %17, %16 : vector<4x2x128xf32>
    %cst_14 = arith.constant dense<0.000000e+00> : vector<2x128xf32>
    %19 = vector.multi_reduction <add>, %4, %cst_14 [0] : vector<4x2x128xf32> to vector<2x128xf32>
    %20 = arith.mulf %19, %8 : vector<2x128xf32>
    %c0_15 = arith.constant 0 : index
    %c0_16 = arith.constant 0 : index
    %c0_17 = arith.constant 0 : index
    %21 = vector.load %arg5[%c0_15, %c0_16, %c0_17] : memref<1x1x128xf32, #tpu.memory_space<vmem>>, vector<1x1x128xf32>
    %22 = vector.shape_cast %21 : vector<1x1x128xf32> to vector<1x128xf32>
    %cst_18 = arith.constant dense<0.000000e+00> : vector<2x128xf32>
    %23 = vector.multi_reduction <add>, %18, %cst_18 [0] : vector<4x2x128xf32> to vector<2x128xf32>
    %cst_19 = arith.constant dense<0.000000e+00> : vector<128xf32>
    %24 = vector.multi_reduction <add>, %23, %cst_19 [0] : vector<2x128xf32> to vector<128xf32>
    %25 = vector.shape_cast %24 : vector<128xf32> to vector<1x128xf32>
    %26 = arith.addf %22, %25 : vector<1x128xf32>
    %c0_20 = arith.constant 0 : index
    %c0_21 = arith.constant 0 : index
    %c0_22 = arith.constant 0 : index
    %27 = vector.load %arg5[%c0_20, %c0_21, %c0_22] : memref<1x1x128xf32, #tpu.memory_space<vmem>>, vector<1x1x128xf32>
    %28 = vector.shape_cast %27 : vector<1x1x128xf32> to vector<1x128xf32>
    %29 = vector.shape_cast %26 : vector<1x128xf32> to vector<1x1x128xf32>
    tpu.vector_store %arg5[%c0_20, %c0_21, %c0_22], %29 {strides = array<i32>} : memref<1x1x128xf32, #tpu.memory_space<vmem>>, vector<1x1x128xf32>,
    %c0_23 = arith.constant 0 : index
    %c0_24 = arith.constant 0 : index
    %c0_25 = arith.constant 0 : index
    %30 = vector.load %arg6[%c0_23, %c0_24, %c0_25] : memref<1x1x128xf32, #tpu.memory_space<vmem>>, vector<1x1x128xf32>
    %31 = vector.shape_cast %30 : vector<1x1x128xf32> to vector<1x128xf32>
    %cst_26 = arith.constant dense<0.000000e+00> : vector<128xf32>
    %32 = vector.multi_reduction <add>, %20, %cst_26 [0] : vector<2x128xf32> to vector<128xf32>
    %33 = vector.shape_cast %32 : vector<128xf32> to vector<1x128xf32>
    %34 = arith.addf %31, %33 : vector<1x128xf32>
    %c0_27 = arith.constant 0 : index
    %c0_28 = arith.constant 0 : index
    %c0_29 = arith.constant 0 : index
    %35 = vector.load %arg6[%c0_27, %c0_28, %c0_29] : memref<1x1x128xf32, #tpu.memory_space<vmem>>, vector<1x1x128xf32>
    %36 = vector.shape_cast %35 : vector<1x1x128xf32> to vector<1x128xf32>
    %37 = vector.shape_cast %34 : vector<1x128xf32> to vector<1x1x128xf32>
    tpu.vector_store %arg6[%c0_27, %c0_28, %c0_29], %37 {strides = array<i32>} : memref<1x1x128xf32, #tpu.memory_space<vmem>>, vector<1x1x128xf32>,
    return
  }
  func.func @transform_0(%arg0: i32, %arg1: i32) -> (i32, i32, i32, i32) {
    %c0_i32 = arith.constant 0 : i32
    %c0_i32_0 = arith.constant 0 : i32
    %c0_i32_1 = arith.constant 0 : i32
    return %arg0, %c0_i32, %arg1, %c0_i32_0 : i32, i32, i32, i32
  }
  func.func @transform_1(%arg0: i32, %arg1: i32) -> (i32, i32, i32, i32) {
    %c0_i32 = arith.constant 0 : i32
    %c0_i32_0 = arith.constant 0 : i32
    %c0_i32_1 = arith.constant 0 : i32
    return %arg0, %c0_i32, %arg1, %c0_i32_0 : i32, i32, i32, i32
  }
  func.func @transform_2(%arg0: i32, %arg1: i32) -> (i32, i32, i32) {
    %c0_i32 = arith.constant 0 : i32
    %c0_i32_0 = arith.constant 0 : i32
    return %arg0, %arg1, %c0_i32 : i32, i32, i32
  }
  func.func @transform_3(%arg0: i32, %arg1: i32) -> (i32, i32, i32) {
    %c0_i32 = arith.constant 0 : i32
    %c0_i32_0 = arith.constant 0 : i32
    %c0_i32_1 = arith.constant 0 : i32
    return %arg0, %c0_i32, %c0_i32_0 : i32, i32, i32
  }
  func.func @transform_4(%arg0: i32, %arg1: i32) -> (i32, i32, i32) {
    %c0_i32 = arith.constant 0 : i32
    %c0_i32_0 = arith.constant 0 : i32
    %c0_i32_1 = arith.constant 0 : i32
    return %arg0, %c0_i32, %c0_i32_0 : i32, i32, i32
  }
}

</mosaic_0001>

<bundles_post_ra>
// kernel: tpu_custom_call.1
= control target key start
LH: loop header
LB: loop body
LE: loop exit
PB: predicated region body
PF: predicated region fallthrough
CT: control target
= control target key end

     0   :  { %s1166_s0 = inlined_call_operand.hbm [shape: f32[2,4,2,128], index: 0, kind: input, shape index: {}]   ;;  %s1167_s1 = inlined_call_operand.hbm [shape: f32[2,4,2,128], index: 1, kind: input, shape index: {}]   ;;  %s1168_s2 = inlined_call_operand.hbm [shape: f32[2,2,128], index: 2, kind: input, shape index: {}]   ;;  %s1169_s3 = inlined_call_operand.hbm [shape: f32[2,1,128], index: 3, kind: output, shape index: {0}]   ;;  %s1170_s4 = inlined_call_operand.hbm [shape: f32[2,1,128], index: 4, kind: output, shape index: {1}]  }
   0x1   :  { %1175 = sst [smem:[#allocation19_spill]] %s1167_s1 }
   0x2   :  { %10 = vsyncpa [#allocation3], 0 }
   0x3   :  { %12 = vsyncpa [#allocation3 + $0x1], 0 }
   0x4   :  { %13 = vsyncpa [#allocation6], 0 }
   0x5   :  { %15 = vsyncpa [#allocation6 + $0x1], 0 }
   0x6   :  { %16 = vsyncpa [#allocation4], 0 }
   0x7   :  { %18 = vsyncpa [#allocation4 + $0x1], 0 }
   0x8   :  { %19 = vsyncpa [#allocation10], 0 }
   0x9   :  { %21 = vsyncpa [#allocation10 + $0x1], 0  ;;  %s922_s15 = smov 0   ;;  %s924_s16 = smov 0  }
   0xa   :  { %s926_s17 = smov 0   ;;  %s928_s18 = smov 0  }
   0xb   :  { %s930_s19 = smov 0   ;;  %s932_s20 = smov 0  }
   0xc LB: > { %1176 = sst [smem:[#allocation15_spill]] %s875_s17  ;;  %s953_s21 = sadd.s32 4294967295, %s887_s20   ;;  %s887_s20 = sphi %s932_s20, %s27_s20   ;;  %s883_s19 = sphi %s930_s19, %s1195_s19   ;;  %s879_s18 = sphi %s928_s18, %s1194_s18   ;;  %s875_s17 = sphi %s926_s17, %s1190_s17   ;;  %s871_s16 = sphi %s924_s16, %s1193_s16   ;;  %s867_s15 = sphi %s922_s15, %s1192_s15  }
   0xd   : > { %1177 = sst [smem:[#allocation16_spill]] %s887_s20  ;;  %s580_s22 = sadd.s32 4294967294, %s887_s20  }
   0xe   : > { %s39_s23 = sadd.s32 1, %s883_s19  ;;  %s48_s24 = sadd.s32 1, %s875_s17 }
   0xf   : > { %p41_p0 = scmp.ge.s32.totalorder %s39_s23, 2  ;;  %p55_p1 = scmp.ne.s32.totalorder %s875_s17, %s871_s16 }
  0x10   : > { %p56_p2 = scmp.eq.s32.totalorder %s887_s20, 0  ;;  %p61_p3 = scmp.ne.s32.totalorder %s871_s16, %s867_s15 }
  0x11   : > { %s1197_s23 = smov (%p41_p0, %s39_s23), 0  ;;  %p62_p5 = scmp.eq.s32.totalorder %s953_s21, 0 }
  0x12   : > { %1178 = sst [smem:[#allocation17_spill]] %s1197_s23  ;;  %p965_p4 = por %p56_p2, %p55_p1 }
  0x13   : > { %s43_s26 = ssub.s32 %s883_s19, %s1197_s23  ;;  %p141_p6 = scmp.eq.s32.totalorder %s953_s21, 1 }
  0x14   : > { %p46_p7 = scmp.eq.s32.totalorder %s43_s26, 0  ;;  %p973_p8 = por %p62_p5, %p61_p3 }
  0x15   : > { %p977_p9 = por %p141_p6, %p55_p1  ;;  %p147_p10 = scmp.eq.s32.totalorder %s580_s22, 1 }
  0x16   : > { %s982_s29 = scalar_select %p46_p7, %s875_s17, %s48_s24  }
  0x17   : > { %p984_p11 = por %p147_p10, %p61_p3  ;;  %p628_p13 = scmp.lt.s32.totalorder %s887_s20, 2 }
  0x18   : > { %1182 = sst [smem:[#allocation18_spill]] %s982_s29  ;;  %s991_s5 = sand.u32 1, %s875_s17  }
  0x19   : > { %s583_s6 = sshll.u32 %s991_s5, 3  ;;  %s599_s7 = sshll.u32 %s883_s19, 7 }
  0x1a   : > { %p997_p0 = pnand %p628_p13, %p965_p4  ;;  %s215_s9 = sand.u32 1, %s887_s20  }
  0x1b   : > { %s1185_s1 = sld [smem:[#allocation19_spill]]  ;;  %s219_s13 = scalar_lea.vmem [#allocation5], %s583_s6 }
  0x1c   : > { %s227_s14 = sshll.u32 %s219_s13, 4  ;;  %p591_p1 = scmp.ge.s32.totalorder %s887_s20, 1  ;;  %s228_s14 = int_to_ptr.vmem [resolvable:$true] %s227_s14 }
  0x1d   : > { %p254_p2 = scmp.lt.s32.totalorder %s887_s20, 3  ;;  %s1011_s22 = scalar_lea.sflag [#allocation6], %s215_s9 }
  0x1e   : > { %p691_p3 = pneg %p997_p0  ;;  %s702_s24 = scalar_lea.vmem %s228_s14, 128 }
  0x1f   : > { %p703_p4 = scmp.ne.s32.totalorder %s228_s14, %s702_s24  ;;  %s889_s25 = smov [#allocation5]  }
  0x20   : > { %s707_s26 = sshll.u32 %s889_s25, 4  ;;  %s708_s26 = int_to_ptr.vmem [resolvable:$false] %s707_s26 }
  0x21   : > { %s226_s12 = scalar_lea.hbm %s1185_s1, %s599_s7  ;;  %p705_p5 = pnand %p703_p4, %p691_p3 }
  0x22   : > { %s709_s10 = scalar_lea.vmem %s708_s26, 256  ;;  %p710_p7 = scmp.lt.s32.totalorder %s228_s14, %s708_s26 }
  0x23   : > { %p706_p6 = pneg %p705_p5  ;;  %p711_p10 = scmp.lt.s32.totalorder %s709_s10, %s702_s24 }
  0x25   : > { %p712_p13 = por %p711_p10, %p710_p7 }
  0x27   : > { %p713_p12 = pnand %p712_p13, %p706_p6 }
  0x29   : > { %716 = shalt.err (!%p713_p12)
}
  0x2a   : > { %s890_s11 = smov 32   ;;  %s891_s9 = smov 2  }
  0x2b   : > { %617 = dma.hbm_to_vmem [thread:$0]  (!%p997_p0), %s226_s12, 128, %s228_s14, %s1011_s22, %s890_s11, %s890_s11, %s891_s9  }
  0x2c   : > { %p1025_p4 = pnand %p591_p1, %p254_p2  ;;  %s204_s26 = scalar_lea.hbm %s1166_s0, %s599_s7 }
  0x2d   : > { %s197_s10 = scalar_lea.vmem [#allocation2], %s583_s6  ;;  %s589_s23 = sshll.u32 %s991_s5, 1 }
  0x2e   : > { %s205_s1 = sshll.u32 %s197_s10, 4  ;;  %s194_s29 = scalar_lea.sflag [#allocation3], %s991_s5  ;;  %s206_s1 = int_to_ptr.vmem [resolvable:$true] %s205_s1 }
  0x2f   : > { %s730_s17 = scalar_lea.vmem %s206_s1, 128  ;;  %s892_s12 = smov [#allocation2]  }
  0x30   : > { %p731_p12 = scmp.ne.s32.totalorder %s206_s1, %s730_s17  ;;  %s735_s14 = sshll.u32 %s892_s12, 4  ;;  %s736_s14 = int_to_ptr.vmem [resolvable:$false] %s735_s14 }
  0x31   : > { %s737_s20 = scalar_lea.vmem %s736_s14, 256  ;;  %p738_p2 = scmp.lt.s32.totalorder %s206_s1, %s736_s14 }
  0x32   : > { %p733_p5 = pnand %p731_p12, %p691_p3  ;;  %p739_p6 = scmp.lt.s32.totalorder %s737_s20, %s730_s17 }
  0x34   : > { %p734_p1 = pneg %p733_p5  ;;  %p740_p7 = por %p739_p6, %p738_p2 }
  0x36   : > { %p741_p10 = pnand %p740_p7, %p734_p1 }
  0x38   : > { %744 = shalt.err (!%p741_p10)
}
  0x39   : > { %614 = dma.hbm_to_vmem [thread:$0]  (!%p997_p0), %s204_s26, 128, %s206_s1, %s194_s29, %s890_s11, %s890_s11, %s891_s9  }
  0x3a   : > { %s590_s5 = sshll.u32 %s883_s19, 5  ;;  %s241_s6 = scalar_lea.vmem [#allocation7], %s589_s23 }
  0x3b   : > { %s249_s7 = sshll.u32 %s241_s6, 4  ;;  %s247_s10 = scalar_lea.hbm %s1168_s2, %s590_s5  ;;  %s250_s7 = int_to_ptr.vmem [resolvable:$true] %s249_s7 }
  0x3c   : > { %s758_s12 = scalar_lea.vmem %s250_s7, 32  ;;  %s893_s17 = smov [#allocation7]  }
  0x3d   : > { %p759_p13 = scmp.ne.s32.totalorder %s250_s7, %s758_s12  ;;  %s763_s20 = sshll.u32 %s893_s17, 4  ;;  %s764_s20 = int_to_ptr.vmem [resolvable:$false] %s763_s20 }
  0x3e   : > { %s765_s14 = scalar_lea.vmem %s764_s20, 64  ;;  %p766_p1 = scmp.lt.s32.totalorder %s250_s7, %s764_s20 }
  0x3f   : > { %p761_p12 = pnand %p759_p13, %p691_p3  ;;  %p767_p2 = scmp.lt.s32.totalorder %s765_s14, %s758_s12 }
  0x41   : > { %p762_p5 = pneg %p761_p12  ;;  %p768_p6 = por %p767_p2, %p766_p1 }
  0x43   : > { %p769_p7 = pnand %p768_p6, %p762_p5 }
  0x45   : > { %772 = shalt.err (!%p769_p7)
}
  0x46   : > { %620 = dma.hbm_to_vmem [thread:$0]  (!%p997_p0), %s247_s10, 32, %s250_s7, %s1011_s22  }
  0x47   : > { %258 = sbr.rel (%p1025_p4) target bundleno = 155 (0x9b), region = 32  ;;  %s1056_s1 = sand.u32 (!%p1025_p4), 1, %s871_s16  }
  0x48   : > { %s592_s23 = sshll.u32 (!%p1025_p4), %s1056_s1, 3  ;;  %s261_s29 = scalar_lea.sflag (!%p1025_p4), [#allocation3], %s1056_s1 }
  0x49   : > { %s264_s11 = scalar_lea.vmem (!%p1025_p4), [#allocation2], %s592_s23 }
  0x4c   : > { %850 = dma.done.wait (%p973_p8), %s261_s29, 128  }
  0x4d   : > { %852 = vsyncadd (%p973_p8), %s261_s29, 4294967168  ;;  %s269_s8 = sand.u32 1, %s953_s21   ;;  %s273_s9 = scalar_lea.vmem [#allocation5], %s592_s23 }
  0x4e   : > { %s270_s22 = scalar_lea.sflag [#allocation6], %s269_s8 }
  0x4f   : > { %854 = dma.done.wait (%p973_p8), %s270_s22, 160  }
  0x50   : > { %856 = vsyncadd (%p973_p8), %s270_s22, 4294967136  ;;  %s1070_s13 = scalar_lea.vmem [#allocation8], %s1056_s1  ;;  %v894_v0 = vmov 0.0   ;;  %s1074_s26 = scalar_lea.vmem [#allocation9], %s1056_s1  ;;  %vm363_vm0 = vcmask 1041408  }
  0x51   : > { %324 = vst [vmem:[%s1070_s13] sm:$0x1] %v894_v0  ;;  %325 = vst [vmem:[%s1074_s26] sm:$0x1] %v894_v0  ;;  %s594_s21 = sshll.u32 %s1056_s1, 1  ;;  %v326_v1 = vld [vmem:[%s264_s11] sm:$0x3]  ;;  %s595_s5 = sshll.u32 %s879_s18, 4 }
  0x52   : > { %v327_v2 = vld [vmem:[%s264_s11 + $0x2] sm:$0x3]  ;;  %v328_v3 = vld [vmem:[%s264_s11 + $0x4] sm:$0x3]  ;;  %v329_v4 = vld [vmem:[%s264_s11 + $0x6] sm:$0x3]  ;;  %s1092_s25 = scalar_lea.hbm %s1170_s4, %s595_s5 }
  0x53   : > { %v330_v5 = vld [vmem:[%s273_s9] sm:$0x3]  ;;  %v331_v6 = vld [vmem:[%s273_s9 + $0x2] sm:$0x3]  ;;  %v332_v7 = vld [vmem:[%s273_s9 + $0x4] sm:$0x3] }
  0x54   : > { %v333_v8 = vld [vmem:[%s273_s9 + $0x6] sm:$0x3]  ;;  %vm335_vm1 = vcmp.ne.f32.partialorder %v330_v5, 0.0  ;;  %vm336_vm2 = vcmp.ne.f32.partialorder %v331_v6, 0.0  ;;  %vm337_vm3 = vcmp.ne.f32.partialorder %v332_v7, 0.0  ;;  %v339_v9 = vsub.f32 1.0, %v326_v1 }
  0x55   : > { %vm338_vm4 = vcmp.ne.f32.partialorder %v333_v8, 0.0  ;;  %v340_v10 = vsub.f32 1.0, %v327_v2  ;;  %v341_v11 = vsub.f32 1.0, %v328_v3  ;;  %v342_v12 = vsub.f32 1.0, %v329_v4  ;;  %s282_s27 = scalar_lea.vmem [#allocation7], %s594_s21  ;;  %s429_s6 = sshll.u32 %s1074_s26, 4  ;;  %s1094_s6 = int_to_ptr.vmem [resolvable:$true] %s429_s6 }
  0x56   : > { %v364_v13 = vsel %vm363_vm0, %v326_v1, 0.0  ;;  %v365_v14 = vsel %vm363_vm0, %v327_v2, 0.0  ;;  %v343_v15 = vsel %vm335_vm1, %v326_v1, %v339_v9  ;;  %v367_v18 = vsel %vm363_vm0, %v328_v3, 0.0  ;;  %v334_v23 = vld [vmem:[%s282_s27] sm:$0x3]  ;;  %s404_s10 = scalar_lea.sflag [#allocation10], %s1056_s1 }
  0x57   : > { %v344_v16 = vsel %vm336_vm2, %v327_v2, %v340_v10  ;;  %v366_v17 = vadd.f32 %v365_v14, %v364_v13  ;;  %v345_v19 = vsel %vm337_vm3, %v328_v3, %v341_v11  ;;  %v346_v20 = vsel %vm338_vm4, %v329_v4, %v342_v12  ;;  %s773_s12 = scalar_lea.vmem %s1094_s6, 16  ;;  %s895_s17 = smov [#allocation9]  }
  0x58   : > { %681 = vlog2.f32 %v343_v15  ;;  %v369_v21 = vsel %vm363_vm0, %v329_v4, 0.0  ;;  %v389_v42 = vld [vmem:[%s1074_s26] sm:$0x1]  ;;  %p774_p8 = scmp.ne.s32.totalorder %s1094_s6, %s773_s12  ;;  %s777_s20 = sshll.u32 %s895_s17, 4  ;;  %s778_s20 = int_to_ptr.vmem [resolvable:$false] %s777_s20 }
  0x59   : > { %683 = vlog2.f32 %v344_v16  ;;  %v368_v22 = vadd.f32 %v367_v18, %v366_v17  ;;  %s779_s14 = scalar_lea.vmem %s778_s20, 32  ;;  %p780_p4 = scmp.lt.s32.totalorder %s1094_s6, %s778_s20 }
  0x5a   : > { %685 = vlog2.f32 %v345_v19  ;;  %p775_p0 = pnand %p774_p8, %p977_p9  ;;  %p781_p10 = scmp.lt.s32.totalorder %s779_s14, %s773_s12 }
  0x5b   : > { %687 = vlog2.f32 %v346_v20  ;;  %v370_v24 = vadd.f32 %v369_v21, %v368_v22 }
  0x5c   : > { %p776_p3 = pneg %p775_p0  ;;  %p782_p13 = por %p781_p10, %p780_p4 }
  0x5d   : > { %v371_v25 = vmul.f32 %v370_v24, %v334_v23 }
  0x5e   : > { %p783_p12 = pnand %p782_p13, %p776_p3 }
  0x5f   : > { %v390_v26 = vsel %vm363_vm0, %v371_v25, 0.0 }
  0x60   : > { %v391_v27 = vrot.slane %v390_v26, 4 }
  0x62   : > { %v392_v28 = vadd.f32 %v391_v27, %v390_v26 }
  0x64   : > { %v393_v29 = vrot.slane %v392_v28, 2 }
  0x65   : > { %v682_v30 = vpop.eup %681 }
  0x66   : > { %v684_v31 = vpop.eup %683  ;;  %v348_v32 = vmul.f32 0.6931472, %v682_v30  ;;  %v394_v33 = vadd.f32 %v393_v29, %v392_v28 }
  0x67   : > { %v686_v34 = vpop.eup %685  ;;  %v350_v35 = vmul.f32 0.6931472, %v684_v31 }
  0x68   : > { %v688_v36 = vpop.eup %687  ;;  %v352_v37 = vmul.f32 0.6931472, %v686_v34  ;;  %v355_v38 = vmax.f32 %v348_v32, -100.0  ;;  %v395_v39 = vrot.slane %v394_v33, 1 }
  0x69   : > { %v354_v40 = vmul.f32 0.6931472, %v688_v36  ;;  %v356_v41 = vmax.f32 %v350_v35, -100.0 }
  0x6a   : > { %v357_v43 = vmax.f32 %v352_v37, -100.0  ;;  %v359_v44 = vsub.f32 0.0, %v355_v38  ;;  %v396_v45 = vadd.f32 %v395_v39, %v394_v33 }
  0x6b   : > { %v358_v46 = vmax.f32 %v354_v40, -100.0  ;;  %v360_v47 = vsub.f32 0.0, %v356_v41 }
  0x6c   : > { %v361_v48 = vsub.f32 0.0, %v357_v43  ;;  %v373_v49 = vsel %vm363_vm0, %v359_v44, 0.0  ;;  %v397_v50 = vadd.f32 %v396_v45, %v389_v42 }
  0x6d   : > { %v362_v51 = vsub.f32 0.0, %v358_v46  ;;  %v374_v52 = vsel %vm363_vm0, %v360_v47, 0.0 }
  0x6e   : > { %v375_v53 = vadd.f32 %v374_v52, %v373_v49  ;;  %v376_v54 = vsel %vm363_vm0, %v361_v48, 0.0  ;;  %398 = vst [vmem:[%s1074_s26] sm:$0x1] %v397_v50 }
  0x6f   : > { %v378_v55 = vsel %vm363_vm0, %v362_v51, 0.0 }
  0x70   : > { %786 = shalt.err (!%p783_p12)
}
  0x71   : > { %s787_s23 = scalar_lea.hbm %s1092_s25, 16  ;;  %s791_s8 = scalar_lea.hbm %s1170_s4, 32 }
  0x72   : > { %p788_p5 = scmp.ne.s32.totalorder %s1092_s25, %s787_s23  ;;  %p792_p6 = scmp.lt.s32.totalorder %s1092_s25, %s1170_s4 }
  0x73   : > { %p793_p7 = scmp.lt.s32.totalorder %s791_s8, %s787_s23 }
  0x74   : > { %p789_p1 = pnand %p788_p5, %p977_p9 }
  0x75   : > { %p794_p8 = por %p793_p7, %p792_p6 }
  0x76   : > { %p790_p2 = pneg %p789_p1 }
  0x78   : > { %p795_p0 = pnand %p794_p8, %p790_p2 }
  0x7a   : > { %798 = shalt.err (!%p795_p0)
}
  0x7b   : > { %608 = dma.vmem_to_hbm [thread:$0]  (%p977_p9), %s1094_s6, 16, %s1092_s25, %s404_s10   ;;  %v377_v56 = vadd.f32 %v376_v54, %v375_v53  ;;  %v372_v0 = vld [vmem:[%s1070_s13] sm:$0x1] }
  0x7c   : > { %s416_s26 = sshll.u32 %s1070_s13, 4  ;;  %s414_s6 = scalar_lea.hbm %s1169_s3, %s595_s5  ;;  %s417_s26 = int_to_ptr.vmem [resolvable:$true] %s416_s26 }
  0x7d   : > { %v379_v57 = vadd.f32 %v378_v55, %v377_v56  ;;  %s400_s7 = scalar_lea.sflag [#allocation4], %s1056_s1  ;;  %s799_s24 = scalar_lea.vmem %s417_s26, 16 }
  0x7e   : > { %p800_p3 = scmp.ne.s32.totalorder %s417_s26, %s799_s24  ;;  %s896_s25 = smov [#allocation8]  }
  0x7f   : > { %v380_v58 = vsel %vm363_vm0, %v379_v57, 0.0  ;;  %s803_s10 = sshll.u32 %s896_s25, 4  ;;  %s804_s10 = int_to_ptr.vmem [resolvable:$false] %s803_s10 }
  0x80   : > { %v381_v59 = vrot.slane %v380_v58, 4  ;;  %p801_p4 = pnand %p800_p3, %p977_p9  ;;  %s805_s12 = scalar_lea.vmem %s804_s10, 32 }
  0x81   : > { %p806_p13 = scmp.lt.s32.totalorder %s417_s26, %s804_s10  ;;  %p807_p12 = scmp.lt.s32.totalorder %s805_s12, %s799_s24 }
  0x82   : > { %v382_v60 = vadd.f32 %v381_v59, %v380_v58  ;;  %p802_p10 = pneg %p801_p4 }
  0x83   : > { %p808_p5 = por %p807_p12, %p806_p13 }
  0x84   : > { %v383_v61 = vrot.slane %v382_v60, 2 }
  0x85   : > { %p809_p1 = pnand %p808_p5, %p802_p10 }
  0x86   : > { %v384_v62 = vadd.f32 %v383_v61, %v382_v60 }
  0x88   : > { %v385_v63 = vrot.slane %v384_v62, 1 }
  0x8a   : > { %v386_v1 = vadd.f32 %v385_v63, %v384_v62 }
  0x8c   : > { %v387_v2 = vadd.f32 %v386_v1, %v372_v0 }
  0x8e   : > { %388 = vst [vmem:[%s1070_s13] sm:$0x1] %v387_v2 }
  0x8f   : > { %812 = shalt.err (!%p809_p1)
}
  0x90   : > { %s813_s18 = scalar_lea.hbm %s414_s6, 16  ;;  %s817_s5 = scalar_lea.hbm %s1169_s3, 32 }
  0x91   : > { %p814_p2 = scmp.ne.s32.totalorder %s414_s6, %s813_s18  ;;  %p818_p8 = scmp.lt.s32.totalorder %s414_s6, %s1169_s3 }
  0x92   : > { %p819_p0 = scmp.lt.s32.totalorder %s817_s5, %s813_s18 }
  0x93   : > { %p815_p6 = pnand %p814_p2, %p977_p9 }
  0x94   : > { %p820_p3 = por %p819_p0, %p818_p8 }
  0x95   : > { %p816_p7 = pneg %p815_p6 }
  0x97   : > { %p821_p4 = pnand %p820_p3, %p816_p7 }
  0x99   : > { %824 = shalt.err (!%p821_p4)
}
  0x9a   : > { %607 = dma.vmem_to_hbm [thread:$0]  (%p977_p9), %s417_s26, 16, %s414_s6, %s400_s7  }
  0x9b PF: > { %s1187_s14 = sld [smem:[#allocation16_spill]]  ;;  %s441_s23 = sand.u32 1, %s867_s15  }
  0x9c   : > { %s442_s29 = scalar_lea.sflag [#allocation4], %s441_s23 }
  0xa1   : > { %p1188_p10 = scmp.ge.s32.totalorder %s1187_s14, 2 }
  0xa3   : > { %p622_p13 = pnand %p1188_p10, %p984_p11 }
  0xa5   : > { %p623_p12 = pneg %p622_p13 }
  0xa7   : > { %858 = dma.done.wait (%p623_p12), %s442_s29, 16  }
  0xa8   : > { %860 = vsyncadd (%p623_p12), %s442_s29, 4294967280  ;;  %s450_s11 = scalar_lea.sflag [#allocation10], %s441_s23 }
  0xa9   : > { %862 = dma.done.wait (%p623_p12), %s450_s11, 16  }
  0xaa   : > { %864 = vsyncadd (%p623_p12), %s450_s11, 4294967280  ;;  %s27_s20 = sadd.s32 1, %s1187_s14   ;;  %s1189_s28 = sld [smem:[#allocation15_spill]] }
  0xab   : > { %p24_p5 = scmp.ge.s32.totalorder %s27_s20, 4   ;;  %s1190_s17 = sld [smem:[#allocation18_spill]] }
  0xac   : > { %s1191_s8 = sld [smem:[#allocation17_spill]]  ;;  %s1192_s15 = smov %s871_s16 }
  0xad   : > { %s1194_s18 = smov %s883_s19 }
  0xae   :  { %26 = sbr.rel (!%p24_p5) target bundleno = 12 (0xc), region = 122 }
  0xb0   : > { %s1193_s16 = smov %s1189_s28 }
  0xb2   : > { %s1195_s19 = smov %s1191_s8 }
  0xb3   :  { %454 = vsyncpa [#allocation3], 1 }
  0xb4   :  { %456 = vsyncpa [#allocation3 + $0x1], 1 }
  0xb5   :  { %457 = vsyncpa [#allocation6], 1 }
  0xb6   :  { %459 = vsyncpa [#allocation6 + $0x1], 1 }
  0xb7   :  { %460 = vsyncpa [#allocation4], 1 }
  0xb8   :  { %462 = vsyncpa [#allocation4 + $0x1], 1 }
  0xb9   :  { %463 = vsyncpa [#allocation10], 1 }
  0xba   :  { %465 = vsyncpa [#allocation10 + $0x1], 1 }

</bundles_post_ra>
